<compile_context>
chip_gen: v6e
topology: v6e:2x2x1
jax: 0.10.0
libtpu: 0.0.40
codegen_flags: <defaults>
</compile_context>

<pallas_src>
import functools

import jax
import jax.numpy as jnp
from jax import lax
from jax.experimental import pallas as pl
from jax.experimental.pallas import tpu as pltpu


def _spectral_conv_kernel(x_ref, w_ref, b_ref, o_ref, col_ref, *,
                          kh, kw, c_in, w_pad, n_wide, tb):
    """Implicit-im2col conv for TB images, one fused K = kh*kw*C_in matmul each.

    x_ref:   (TB, C_in, L_flat)        bf16  zero-padded images, spatial flattened
    w_ref:   (C_out_pad, K)            bf16  (W / sigma) flattened as (o, (i,j,c))
    b_ref:   (C_out_pad, 1)            f32   bias column
    o_ref:   (TB, C_out_pad, N_wide)   f32   transposed "wide" stride-1 output
    col_ref: (K, N_wide)               bf16  VMEM im2col scratch
    """
    w = w_ref[...]                              # hoisted: same weights for all images
    b = b_ref[...]
    for t in range(tb):                         # static unroll over the batch chunk
        # Stage the receptive field: each (i, j) shift is a contiguous lane slice of
        # the flattened image (offset i*W_pad + j) -> static VMEM-only copies.
        for i in range(kh):
            for j in range(kw):
                row0 = (i * kw + j) * c_in
                off = i * w_pad + j
                col_ref[pl.ds(row0, c_in), :] = x_ref[t, :, pl.ds(off, n_wide)]
        # Single MXU matmul, full K contraction, f32 accumulation.
        acc = jnp.dot(w, col_ref[...], preferred_element_type=jnp.float32)
        o_ref[t, :, :] = (acc + b).astype(o_ref.dtype)


def spectral_conv2d(x, weight, bias, u, *, stride=(1, 1), padding=(0, 0), eps=1e-12):
    """Forward of torch.nn.utils.spectral_norm(nn.Conv2d(...)) in training mode:
    one power iteration -> sigma, then conv2d(x, W / sigma, bias).
    x: (B, C_in, H, W) NCHW.  weight: (C_out, C_in, kh, kw) OIHW.
    Returns (output NCHW, updated u)."""
    B, C_in, H, W = x.shape
    C_out, C_in_w, kh, kw = weight.shape
    assert C_in_w == C_in  # TODO(synk): groups!=1 / dilation!=1 / padding_mode!='zeros' not implemented
    sh, sw = stride
    ph, pw = padding

    # ---- spectral-norm power iteration (tiny matvecs: parameter glue) ----
    # u, v are detached (torch computes them under no_grad); sigma keeps grad wrt W.
    w_mat = weight.reshape(C_out, -1)
    v = w_mat.T @ u
    v = v / jnp.maximum(jnp.linalg.norm(v), eps)
    u_new = w_mat @ v
    u_new = u_new / jnp.maximum(jnp.linalg.norm(u_new), eps)
    u_sg = lax.stop_gradient(u_new)
    v_sg = lax.stop_gradient(v)
    sigma = jnp.dot(u_sg, w_mat @ v_sg)

    # ---- layout prep (cheap XLA glue; no materialized im2col in HBM) ----
    H_pad, W_pad = H + 2 * ph, W + 2 * pw
    H1, W1 = H_pad - kh + 1, W_pad - kw + 1          # stride-1 output extent
    N_wide = H1 * W_pad                              # "wide" output: W_pad cols per row
    L_need = H_pad * W_pad + (kw - 1)                # max shift offset + N_wide
    L_flat = ((L_need + 127) // 128) * 128           # lane-tidy flattened length
    K = kh * kw * C_in
    C_out_pad = ((C_out + 7) // 8) * 8               # 8-sublane minimum only (no 128 pad)

    xp = jnp.pad(x, ((0, 0), (0, 0), (ph, ph), (pw, pw)))          # NCHW zero-pad
    x_flat = xp.reshape(B, C_in, H_pad * W_pad)
    x_flat = jnp.pad(x_flat, ((0, 0), (0, 0), (0, L_flat - H_pad * W_pad)))
    x_flat = x_flat.astype(jnp.bfloat16)

    # Fold 1/sigma into the weights once (in f32, before the bf16 cast).
    w_flat = jnp.transpose(weight / sigma, (0, 2, 3, 1)).reshape(C_out, K)  # (o,(i,j,c))
    w_flat = jnp.pad(w_flat, ((0, C_out_pad - C_out), (0, 0))).astype(jnp.bfloat16)
    b_col = jnp.pad(bias.astype(jnp.float32), (0, C_out_pad - C_out)).reshape(C_out_pad, 1)

    # Batch folding: grid of 2 for even B (amortizes per-step overhead and keeps both
    # TensorCores busy on dual-TC parts), otherwise one image per grid step.
    TB = B // 2 if (B % 2 == 0 and B >= 2) else 1
    grid = (B // TB,)

    kernel = functools.partial(_spectral_conv_kernel, kh=kh, kw=kw, c_in=C_in,
                               w_pad=W_pad, n_wide=N_wide, tb=TB)

    flops = 2 * B * C_out_pad * K * N_wide
    bytes_accessed = (B * C_in * L_flat * 2 + C_out_pad * K * 2 + C_out_pad * 4
                      + B * C_out_pad * N_wide * 4)

    # TODO(synk): for large H*W or C_in, add an H-tile grid axis (halo via overlapping
    # index_map) and set vmem_limit_bytes explicitly (v7x has only 64 MiB VMEM).
    # TODO(synk): on v7x, use pltpu.CORE_PARALLEL / core_map on the batch axis to
    # guarantee both TensorCores are engaged.
    out_wide = pl.pallas_call(
        kernel,
        out_shape=jax.ShapeDtypeStruct((B, C_out_pad, N_wide), jnp.float32),
        grid_spec=pltpu.PrefetchScalarGridSpec(
            num_scalar_prefetch=0,
            grid=grid,
            in_specs=[
                pl.BlockSpec((TB, C_in, L_flat), lambda b: (b, 0, 0)),   # images
                pl.BlockSpec((C_out_pad, K), lambda b: (0, 0)),          # weights
                pl.BlockSpec((C_out_pad, 1), lambda b: (0, 0)),          # bias
            ],
            out_specs=pl.BlockSpec((TB, C_out_pad, N_wide), lambda b: (b, 0, 0)),
            scratch_shapes=[pltpu.VMEM((K, N_wide), jnp.bfloat16)],
        ),
        compiler_params=pltpu.CompilerParams(
            dimension_semantics=("parallel",)),
        cost_estimate=pl.CostEstimate(flops=flops, transcendentals=0,
                                      bytes_accessed=bytes_accessed),
    )(x_flat, w_flat, b_col)

    # Drop channel padding + the kw-1 wrap-around columns per row, apply stride.
    # Output is already NCHW (transposed kernel layout) -> no final transpose.
    # TODO(synk): for stride > 1, fold the subsampling into the kernel (strided pl.ds).
    out = out_wide[:, :C_out, :].reshape(B, C_out, H1, W_pad)
    out = out[:, :, ::sh, :W1:sw]
    return out, u_sg


if __name__ == "__main__":
    key = jax.random.PRNGKey(0)
    k_x, k_w, k_b, k_u = jax.random.split(key, 4)

    # SpectralConv2d(in_channels=4, out_channels=8, kernel_size=3, padding=1)
    B, C_in, H, W = 2, 4, 16, 16
    C_out, kh, kw = 8, 3, 3
    stride, padding = (1, 1), (1, 1)

    x = jax.random.normal(k_x, (B, C_in, H, W), jnp.float32)

    # Deterministic parameter init (shapes per nn.Conv2d; Kaiming-uniform-like bounds).
    fan_in = C_in * kh * kw
    bound = 1.0 / float(jnp.sqrt(fan_in))
    weight = jax.random.uniform(k_w, (C_out, C_in, kh, kw), jnp.float32, -bound, bound)
    bias = jax.random.uniform(k_b, (C_out,), jnp.float32, -bound, bound)
    u0 = jax.random.normal(k_u, (C_out,), jnp.float32)
    u0 = u0 / jnp.maximum(jnp.linalg.norm(u0), 1e-12)

    fwd = jax.jit(functools.partial(spectral_conv2d, stride=stride, padding=padding))
    out, u_new = fwd(x, weight, bias, u0)
    out = jax.block_until_ready(out)

    # ---- reference (pure JAX) mirroring the kernel's bf16-operand / f32-accum path ----
    w_mat = weight.reshape(C_out, -1)
    v = w_mat.T @ u0
    v = v / jnp.maximum(jnp.linalg.norm(v), 1e-12)
    u1 = w_mat @ v
    u1 = u1 / jnp.maximum(jnp.linalg.norm(u1), 1e-12)
    sigma = jnp.dot(u1, w_mat @ v)
    x_b = x.astype(jnp.bfloat16).astype(jnp.float32)
    w_b = (weight / sigma).astype(jnp.bfloat16).astype(jnp.float32)
    ref = lax.conv_general_dilated(
        x_b, w_b, window_strides=stride,
        padding=((padding[0], padding[0]), (padding[1], padding[1])),
        dimension_numbers=("NCHW", "OIHW", "NCHW"),
        preferred_element_type=jnp.float32,
    ) + bias[None, :, None, None]

    H_out = (H + 2 * padding[0] - kh) // stride[0] + 1
    W_out = (W + 2 * padding[1] - kw) // stride[1] + 1
    assert out.shape == (B, C_out, H_out, W_out), out.shape
    err = float(jnp.max(jnp.abs(out - ref)))
    assert jnp.allclose(out, ref, rtol=2e-3, atol=2e-3), err
    assert jnp.allclose(u_new, u1, rtol=1e-4, atol=1e-4)
    print("KERNEL_OK")
</pallas_src>

<mosaic_0001>
module attributes {stable_mosaic.version = 11 : i64} {
  func.func @_spectral_conv_kernel(%arg0: i32, %arg1: memref<1x4x384xbf16, #tpu.memory_space<vmem>>, %arg2: memref<8x36xbf16, #tpu.memory_space<vmem>>, %arg3: memref<8x1xf32, #tpu.memory_space<vmem>>, %arg4: memref<1x8x288xf32, #tpu.memory_space<vmem>>, %arg5: memref<36x288xbf16, #tpu.memory_space<vmem>>) attributes {dimension_semantics = [#tpu.dimension_semantics<parallel>], iteration_bounds = array<i64: 2>, scalar_prefetch = 0 : i64, scratch_operands = 1 : i64, tpu.core_type = #tpu.core_type<tc>, window_params = [{transform_indices = @transform_0, window_bounds = array<i64: 1, 4, 384>}, {pipeline_mode = #tpu.pipeline_mode<synchronous>, transform_indices = @transform_1, window_bounds = array<i64: 8, 36>}, {pipeline_mode = #tpu.pipeline_mode<synchronous>, transform_indices = @transform_2, window_bounds = array<i64: 8, 1>}, {transform_indices = @transform_3, window_bounds = array<i64: 1, 8, 288>}]} {
    %c0 = arith.constant 0 : index
    %c0_0 = arith.constant 0 : index
    %0 = vector.load %arg2[%c0, %c0_0] : memref<8x36xbf16, #tpu.memory_space<vmem>>, vector<8x36xbf16>
    %c0_1 = arith.constant 0 : index
    %c0_2 = arith.constant 0 : index
    %1 = vector.load %arg3[%c0_1, %c0_2] : memref<8x1xf32, #tpu.memory_space<vmem>>, vector<8x1xf32>
    %c0_3 = arith.constant 0 : index
    %c0_4 = arith.constant 0 : index
    %c0_5 = arith.constant 0 : index
    %2 = vector.load %arg1[%c0_3, %c0_4, %c0_5] : memref<1x4x384xbf16, #tpu.memory_space<vmem>>, vector<1x4x288xbf16>
    %3 = vector.shape_cast %2 : vector<1x4x288xbf16> to vector<4x288xbf16>
    %c0_6 = arith.constant 0 : index
    %c0_7 = arith.constant 0 : index
    %4 = vector.load %arg5[%c0_6, %c0_7] : memref<36x288xbf16, #tpu.memory_space<vmem>>, vector<4x288xbf16>
    tpu.vector_store %arg5[%c0_6, %c0_7], %3 {strides = array<i32>} : memref<36x288xbf16, #tpu.memory_space<vmem>>, vector<4x288xbf16>,
    %c0_8 = arith.constant 0 : index
    %c0_9 = arith.constant 0 : index
    %c1 = arith.constant 1 : index
    %5 = vector.load %arg1[%c0_8, %c0_9, %c1] : memref<1x4x384xbf16, #tpu.memory_space<vmem>>, vector<1x4x288xbf16>
    %6 = vector.shape_cast %5 : vector<1x4x288xbf16> to vector<4x288xbf16>
    %c4 = arith.constant 4 : index
    %c0_10 = arith.constant 0 : index
    %7 = vector.load %arg5[%c4, %c0_10] : memref<36x288xbf16, #tpu.memory_space<vmem>>, vector<4x288xbf16>
    tpu.vector_store %arg5[%c4, %c0_10], %6 {strides = array<i32>} : memref<36x288xbf16, #tpu.memory_space<vmem>>, vector<4x288xbf16>,
    %c0_11 = arith.constant 0 : index
    %c0_12 = arith.constant 0 : index
    %c2 = arith.constant 2 : index
    %8 = vector.load %arg1[%c0_11, %c0_12, %c2] : memref<1x4x384xbf16, #tpu.memory_space<vmem>>, vector<1x4x288xbf16>
    %9 = vector.shape_cast %8 : vector<1x4x288xbf16> to vector<4x288xbf16>
    %c8 = arith.constant 8 : index
    %c0_13 = arith.constant 0 : index
    %10 = vector.load %arg5[%c8, %c0_13] : memref<36x288xbf16, #tpu.memory_space<vmem>>, vector<4x288xbf16>
    tpu.vector_store %arg5[%c8, %c0_13], %9 {strides = array<i32>} : memref<36x288xbf16, #tpu.memory_space<vmem>>, vector<4x288xbf16>,
    %c0_14 = arith.constant 0 : index
    %c0_15 = arith.constant 0 : index
    %c18 = arith.constant 18 : index
    %11 = vector.load %arg1[%c0_14, %c0_15, %c18] : memref<1x4x384xbf16, #tpu.memory_space<vmem>>, vector<1x4x288xbf16>
    %12 = vector.shape_cast %11 : vector<1x4x288xbf16> to vector<4x288xbf16>
    %c12 = arith.constant 12 : index
    %c0_16 = arith.constant 0 : index
    %13 = vector.load %arg5[%c12, %c0_16] : memref<36x288xbf16, #tpu.memory_space<vmem>>, vector<4x288xbf16>
    tpu.vector_store %arg5[%c12, %c0_16], %12 {strides = array<i32>} : memref<36x288xbf16, #tpu.memory_space<vmem>>, vector<4x288xbf16>,
    %c0_17 = arith.constant 0 : index
    %c0_18 = arith.constant 0 : index
    %c19 = arith.constant 19 : index
    %14 = vector.load %arg1[%c0_17, %c0_18, %c19] : memref<1x4x384xbf16, #tpu.memory_space<vmem>>, vector<1x4x288xbf16>
    %15 = vector.shape_cast %14 : vector<1x4x288xbf16> to vector<4x288xbf16>
    %c16 = arith.constant 16 : index
    %c0_19 = arith.constant 0 : index
    %16 = vector.load %arg5[%c16, %c0_19] : memref<36x288xbf16, #tpu.memory_space<vmem>>, vector<4x288xbf16>
    tpu.vector_store %arg5[%c16, %c0_19], %15 {strides = array<i32>} : memref<36x288xbf16, #tpu.memory_space<vmem>>, vector<4x288xbf16>,
    %c0_20 = arith.constant 0 : index
    %c0_21 = arith.constant 0 : index
    %c20 = arith.constant 20 : index
    %17 = vector.load %arg1[%c0_20, %c0_21, %c20] : memref<1x4x384xbf16, #tpu.memory_space<vmem>>, vector<1x4x288xbf16>
    %18 = vector.shape_cast %17 : vector<1x4x288xbf16> to vector<4x288xbf16>
    %c20_22 = arith.constant 20 : index
    %c0_23 = arith.constant 0 : index
    %19 = vector.load %arg5[%c20_22, %c0_23] : memref<36x288xbf16, #tpu.memory_space<vmem>>, vector<4x288xbf16>
    tpu.vector_store %arg5[%c20_22, %c0_23], %18 {strides = array<i32>} : memref<36x288xbf16, #tpu.memory_space<vmem>>, vector<4x288xbf16>,
    %c0_24 = arith.constant 0 : index
    %c0_25 = arith.constant 0 : index
    %c36 = arith.constant 36 : index
    %20 = vector.load %arg1[%c0_24, %c0_25, %c36] : memref<1x4x384xbf16, #tpu.memory_space<vmem>>, vector<1x4x288xbf16>
    %21 = vector.shape_cast %20 : vector<1x4x288xbf16> to vector<4x288xbf16>
    %c24 = arith.constant 24 : index
    %c0_26 = arith.constant 0 : index
    %22 = vector.load %arg5[%c24, %c0_26] : memref<36x288xbf16, #tpu.memory_space<vmem>>, vector<4x288xbf16>
    tpu.vector_store %arg5[%c24, %c0_26], %21 {strides = array<i32>} : memref<36x288xbf16, #tpu.memory_space<vmem>>, vector<4x288xbf16>,
    %c0_27 = arith.constant 0 : index
    %c0_28 = arith.constant 0 : index
    %c37 = arith.constant 37 : index
    %23 = vector.load %arg1[%c0_27, %c0_28, %c37] : memref<1x4x384xbf16, #tpu.memory_space<vmem>>, vector<1x4x288xbf16>
    %24 = vector.shape_cast %23 : vector<1x4x288xbf16> to vector<4x288xbf16>
    %c28 = arith.constant 28 : index
    %c0_29 = arith.constant 0 : index
    %25 = vector.load %arg5[%c28, %c0_29] : memref<36x288xbf16, #tpu.memory_space<vmem>>, vector<4x288xbf16>
    tpu.vector_store %arg5[%c28, %c0_29], %24 {strides = array<i32>} : memref<36x288xbf16, #tpu.memory_space<vmem>>, vector<4x288xbf16>,
    %c0_30 = arith.constant 0 : index
    %c0_31 = arith.constant 0 : index
    %c38 = arith.constant 38 : index
    %26 = vector.load %arg1[%c0_30, %c0_31, %c38] : memref<1x4x384xbf16, #tpu.memory_space<vmem>>, vector<1x4x288xbf16>
    %27 = vector.shape_cast %26 : vector<1x4x288xbf16> to vector<4x288xbf16>
    %c32 = arith.constant 32 : index
    %c0_32 = arith.constant 0 : index
    %28 = vector.load %arg5[%c32, %c0_32] : memref<36x288xbf16, #tpu.memory_space<vmem>>, vector<4x288xbf16>
    tpu.vector_store %arg5[%c32, %c0_32], %27 {strides = array<i32>} : memref<36x288xbf16, #tpu.memory_space<vmem>>, vector<4x288xbf16>,
    %c0_33 = arith.constant 0 : index
    %c0_34 = arith.constant 0 : index
    %29 = vector.load %arg5[%c0_33, %c0_34] : memref<36x288xbf16, #tpu.memory_space<vmem>>, vector<36x288xbf16>
    %cst = arith.constant dense<0.000000e+00> : vector<8x288xf32>
    %30 = tpu.matmul %0, %29, %cst {dimension_numbers = #tpu.dot_dimension_numbers<[1], [0], [0], [1], [0, 0, 1, 1], [], []>} : vector<8x36xbf16>, vector<36x288xbf16>, vector<8x288xf32> -> vector<8x288xf32>
    %31 = vector.broadcast %1 : vector<8x1xf32> to vector<8x288xf32>
    %32 = arith.addf %30, %31 : vector<8x288xf32>
    %c0_35 = arith.constant 0 : index
    %c0_36 = arith.constant 0 : index
    %c0_37 = arith.constant 0 : index
    %33 = vector.load %arg4[%c0_35, %c0_36, %c0_37] : memref<1x8x288xf32, #tpu.memory_space<vmem>>, vector<1x8x288xf32>
    %34 = vector.shape_cast %33 : vector<1x8x288xf32> to vector<8x288xf32>
    %35 = vector.shape_cast %32 : vector<8x288xf32> to vector<1x8x288xf32>
    tpu.vector_store %arg4[%c0_35, %c0_36, %c0_37], %35 {strides = array<i32>} : memref<1x8x288xf32, #tpu.memory_space<vmem>>, vector<1x8x288xf32>,
    return
  }
  func.func @transform_0(%arg0: i32) -> (i32, i32, i32) {
    %c0_i32 = arith.constant 0 : i32
    %c0_i32_0 = arith.constant 0 : i32
    %c0_i32_1 = arith.constant 0 : i32
    return %arg0, %c0_i32, %c0_i32_0 : i32, i32, i32
  }
  func.func @transform_1(%arg0: i32) -> (i32, i32) {
    %c0_i32 = arith.constant 0 : i32
    %c0_i32_0 = arith.constant 0 : i32
    %c0_i32_1 = arith.constant 0 : i32
    return %c0_i32, %c0_i32_0 : i32, i32
  }
  func.func @transform_2(%arg0: i32) -> (i32, i32) {
    %c0_i32 = arith.constant 0 : i32
    %c0_i32_0 = arith.constant 0 : i32
    %c0_i32_1 = arith.constant 0 : i32
    return %c0_i32, %c0_i32_0 : i32, i32
  }
  func.func @transform_3(%arg0: i32) -> (i32, i32, i32) {
    %c0_i32 = arith.constant 0 : i32
    %c0_i32_0 = arith.constant 0 : i32
    %c0_i32_1 = arith.constant 0 : i32
    return %arg0, %c0_i32, %c0_i32_0 : i32, i32, i32
  }
}

</mosaic_0001>

<bundles_post_ra>
// kernel: spectral_conv2d.1
= control target key start
LH: loop header
LB: loop body
LE: loop exit
PB: predicated region body
PF: predicated region fallthrough
CT: control target
= control target key end

     0   :  { %s766_s12 = smov 0   ;;  %s847_s0 = inlined_call_operand.vmem [shape: bf16[2,4,384], index: 0, kind: input, shape index: {}]   ;;  %s848_s1 = inlined_call_operand.vmem [shape: bf16[8,36], index: 1, kind: input, shape index: {}]   ;;  %s849_s2 = inlined_call_operand.vmem [shape: f32[8,1], index: 2, kind: input, shape index: {}]   ;;  %s850_s3 = inlined_call_operand.vmem [shape: f32[2,8,288], index: 3, kind: output, shape index: {}]  }
   0x1 LB: > { %s647_s13 = sadd.s32 4294967295, %s732_s12   ;;  %p651_p0 = scmp.ge.s32.totalorder %s732_s12, 1  ;;  %s732_s12 = sphi %s766_s12, %s13_s12  }
   0x2   : > { %p137_p1 = scmp.lt.s32.totalorder %s732_s12, 3 }
   0x4   : > { %p138_p2 = pnand %p651_p0, %p137_p1 }
   0x5   : > { %p161_p3 = scmp.lt.s32.totalorder (!%p138_p2), %s647_s13, 1  ;;  %s735_s18 = smov (!%p138_p2), 90  }
   0x6   : > { %141 = sbr.rel (%p138_p2) target bundleno = 378 (0x17a), region = 32  ;;  %s736_s19 = smov (!%p138_p2), 109  }
   0x7   : > { %s737_s20 = smov (!%p138_p2), 92   ;;  %s738_s21 = smov (!%p138_p2), 108  }
   0x8   : > { %s740_s22 = smov (!%p138_p2), 91   ;;  %s741_s23 = smov (!%p138_p2), 127  }
   0x9   : > { %s742_s24 = smov (!%p138_p2), 126   ;;  %s744_s25 = smov (!%p138_p2), 110  }
   0xb   : > { %v187_v0 = vlaneseq  ;;  %v734_v1 = vmov 1983009808   ;;  %s852_s13 = smov (!%p161_p3, %s647_s13), 1  ;;  %vm194_vm0 = vcmask 254976   ;;  %v739_v24 = vmov 0.0   ;;  %v173_v43 = vld [vmem:[%s849_s2] sm:$0xff] }
   0xc   : > { %v185_v2 = vunpack.c.l.s4 %v734_v1  ;;  %s683_s14 = smul.u32 6, %s852_s13  ;;  %673 = vmatprep.subr.bf16.mxu1 %v739_v24  ;;  %vm743_vm1 = vmmov 0   ;;  %v745_v42 = vmov 0   ;;  %vm226_vm2 = vcmask 257026  }
   0xd   : > { %v188_v3 = vshrl.u32 %v187_v0, 7  ;;  %679 = vmatprep.mubr.msk.bf16.mxu1 %vm743_vm1, %v739_v24  ;;  %539 = vmatprep.mubr.bf16.mxu0 %v745_v42  ;;  %vm219_vm3 = vcmask 1043456   ;;  %vm432_vm4 = vcmask 736256   ;;  %vm312_vm5 = vcmask 891904   ;;  %s684_s30 = smul.u32 24, %s852_s13 }
   0xe   : > { %v186_v4 = vunpack.c.0.s8 %v185_v2  ;;  %s782_s17 = scalar_lea.vmem %s847_s0, %s683_s14  ;;  %705 = vset.pattern.permute.xlu0 %v745_v42  ;;  %vm342_vm6 = vcmask 883712   ;;  %vm372_vm7 = vcmask 752640   ;;  %vm497_vm8 = vcmask 1041408  }
   0xf   : > { %v408_v6 = vld [vmem:[%s782_s17] sm:$0x3f]  ;;  %vm402_vm9 = vcmask 744448   ;;  %vm221_vm10 = vcmask 1039360   ;;  %vm252_vm11 = vcmask 1031168   ;;  %vm282_vm12 = vcmask 900096   ;;  %s170_s6 = scalar_lea.vmem %s850_s3, %s684_s30 }
  0x10   : > { %v777_v5 = vsub.s32 %v186_v4, %v188_v3  ;;  %v288_v7 = vld [vmem:[%s782_s17] sm:$0x3f]  ;;  %v410_v12 = vcombine.high %v408_v6, %v408_v6  ;;  %vm493_vm13 = vcmask 293888   ;;  %vm590_vm14 = vcmask 261120  }
  0x11   : > { %v348_v8 = vld [vmem:[%s782_s17] sm:$0x3f]  ;;  %v290_v14 = vcombine.high %v288_v7, %v288_v7 }
  0x12   : > { %v417_v9 = vrot.slane %v408_v6, %v777_v5  ;;  %v297_v10 = vrot.slane %v288_v7, %v777_v5  ;;  %v318_v11 = vld [vmem:[%s782_s17] sm:$0x3f]  ;;  %v357_v15 = vrot.slane %v348_v8, %v777_v5  ;;  %v424_v19 = vrot.slane %v410_v12, %v777_v5 }
  0x13   : > { %v174_v13 = vld [vmem:[%s782_s17] sm:$0x3f]  ;;  %v334_v16 = vrot.slane %v318_v11, %v777_v5  ;;  %v320_v17 = vcombine.low %v318_v11, %v318_v11  ;;  %v304_v20 = vrot.slane %v290_v14, %v777_v5  ;;  %v350_v21 = vcombine.high %v348_v8, %v348_v8 }
  0x14   : > { %425 = vrot.lane.b32.xlu0 %v417_v9, %s735_s18  ;;  %305 = vrot.lane.b32.xlu1 %v297_v10, %s736_s19  ;;  %654 = vst.sshfl [vmem:[#allocation2] sm:$0xf pattern:$0x76325410] %v174_v13  ;;  %v176_v18 = vcombine.high %v174_v13, %v174_v13  ;;  %v378_v22 = vld [vmem:[%s782_s17] sm:$0x3f] }
  0x15   : > { %v327_v25 = vrot.slane %v320_v17, %v777_v5  ;;  %v364_v26 = vrot.slane %v350_v21, %v777_v5  ;;  %v380_v27 = vcombine.low %v378_v22, %v378_v22  ;;  %v196_v28 = vld [vmem:[%s782_s17] sm:$0x3f]  ;;  %v394_v30 = vrot.slane %v378_v22, %v777_v5 }
  0x16   : > { %v190_v23 = vrot.slane %v176_v18, %v777_v5  ;;  %v198_v31 = vcombine.low %v196_v28, %v196_v28  ;;  %v228_v32 = vld [vmem:[%s782_s17] sm:$0x3f]  ;;  %v212_v33 = vrot.slane %v196_v28, %v777_v5 }
  0x17   : > { %v387_v29 = vrot.slane %v380_v27, %v777_v5  ;;  %v230_v35 = vcombine.high %v228_v32, %v228_v32  ;;  %v258_v36 = vld [vmem:[%s782_s17] sm:$0x3f]  ;;  %v237_v38 = vrot.slane %v228_v32, %v777_v5 }
  0x18   : > { %365 = vrot.lane.b32.xlu0 %v357_v15, %s737_s20  ;;  %337 = vrot.lane.b32.xlu1 %v334_v16, %s738_s21  ;;  %195 = vst.msk [vmem:[#allocation2 + $0x8] sm:$0x3] %vm194_vm0, %v190_v23  ;;  %v205_v34 = vrot.slane %v198_v31, %v777_v5  ;;  %v260_v39 = vcombine.low %v258_v36, %v258_v36 }
  0x19   : > { %v244_v37 = vrot.slane %v230_v35, %v777_v5  ;;  %v274_v40 = vrot.slane %v258_v36, %v777_v5 }
  0x1a   : > { %v267_v41 = vrot.slane %v260_v39, %v777_v5 }
  0x1c   : > { %427 = vrot.lane.b32.xlu0 %v424_v19, %s735_s18  ;;  %307 = vrot.lane.b32.xlu1 %v304_v20, %s736_s19 }
  0x20   : > { %335 = vrot.lane.b32.xlu0 %v327_v25, %s738_s21  ;;  %367 = vrot.lane.b32.xlu1 %v364_v26, %s737_s20 }
  0x24   : > { %395 = vrot.lane.b32.xlu0 %v387_v29, %s740_s22  ;;  %397 = vrot.lane.b32.xlu1 %v394_v30, %s740_s22 }
  0x28   : > { %215 = vrot.lane.b32.xlu1 %v212_v33, %s741_s23  ;;  %213 = vrot.lane.b32.xlu0 %v205_v34, %s741_s23 }
  0x2c   : > { %247 = vrot.lane.b32.xlu1 %v244_v37, %s742_s24  ;;  %245 = vrot.lane.b32.xlu0 %v237_v38, %s742_s24 }
  0x30   : > { %277 = vrot.lane.b32.xlu1 %v274_v40, %s744_s25  ;;  %275 = vrot.lane.b32.xlu0 %v267_v41, %s744_s25 }
  0x34   : > { %450 = vperm.xlu0 %705, %v173_v43  }
  0x86   : > { %v426_v44 = vpop.permute.xlu0 %425  ;;  %v306_v45 = vpop.permute.xlu1 %305 }
  0x87   : > { %v429_v50 = vrot.slane %v426_v44, 4  ;;  %v309_v51 = vrot.slane %v306_v45, 4 }
  0x8a   : > { %v366_v46 = vpop.permute.xlu0 %365  ;;  %v338_v47 = vpop.permute.xlu1 %337 }
  0x8b   : > { %347 = vst.msk [vmem:[#allocation2 + $0x20] sm:$0xc] %vm226_vm2, %v338_v47  ;;  %v369_v60 = vrot.slane %v366_v46, 4  ;;  %v340_v61 = vrot.slane %v338_v47, 4 }
  0x8e   : > { %v428_v48 = vpop.permute.xlu0 %427  ;;  %v308_v49 = vpop.permute.xlu1 %307 }
  0x8f   : > { %v430_v52 = vrot.slane %v428_v48, 4  ;;  %437 = vst.msk [vmem:[#allocation2 + $0x38] sm:$0x3] %vm194_vm0, %v428_v48  ;;  %v310_v53 = vrot.slane %v308_v49, 4  ;;  %317 = vst.msk [vmem:[#allocation2 + $0x20] sm:$0x3] %vm194_vm0, %v308_v49 }
  0x91   : > { %v431_v54 = vsel %vm219_vm3, %v429_v50, %v430_v52  ;;  %v311_v55 = vsel %vm219_vm3, %v309_v51, %v310_v53 }
  0x92   : > { %v433_v56 = vsel %vm432_vm4, %v426_v44, %v431_v54  ;;  %v313_v57 = vsel %vm312_vm5, %v306_v45, %v311_v55  ;;  %v336_v58 = vpop.permute.xlu0 %335  ;;  %v368_v59 = vpop.permute.xlu1 %367 }
  0x93   : > { %436 = vst [vmem:[#allocation2 + $0x30] sm:$0x33] %v433_v56  ;;  %316 = vst [vmem:[#allocation2 + $0x18] sm:$0x33] %v313_v57  ;;  %v339_v62 = vrot.slane %v336_v58, 4  ;;  %v370_v63 = vrot.slane %v368_v59, 4 }
  0x94   : > { %377 = vst.msk [vmem:[#allocation2 + $0x2c] sm:$0x3] %vm194_vm0, %v368_v59 }
  0x95   : > { %v341_v0 = vsel %vm219_vm3, %v339_v62, %v340_v61  ;;  %v371_v1 = vsel %vm219_vm3, %v369_v60, %v370_v63 }
  0x96   : > { %v343_v2 = vsel %vm342_vm6, %v336_v58, %v341_v0  ;;  %v373_v3 = vsel %vm372_vm7, %v366_v46, %v371_v1  ;;  %v396_v4 = vpop.permute.xlu0 %395  ;;  %v398_v5 = vpop.permute.xlu1 %397  ;;  %v715_v6 = vld [vmem:[#allocation2 + $0x38] ss:$0 sps:$4 sm:$0x33]  }
  0x97   : > { %346 = vst [vmem:[#allocation2 + $0x18] sm:$0xcc] %v343_v2  ;;  %376 = vst [vmem:[#allocation2 + $0x24] sm:$0x33] %v373_v3  ;;  %v399_v7 = vrot.slane %v396_v4, 4  ;;  %v400_v8 = vrot.slane %v398_v5, 4 }
  0x98   : > { %407 = vst.msk [vmem:[#allocation2 + $0x2c] sm:$0xc] %vm226_vm2, %v398_v5  ;;  %v505_v9 = vsel %vm497_vm8, %v715_v6, 0 }
  0x99   : > { %v401_v10 = vsel %vm219_vm3, %v399_v7, %v400_v8  ;;  %674 = vmatpush3.bf16.msra.mxu1 %v505_v9 }
  0x9a   : > { %v403_v11 = vsel %vm402_vm9, %v396_v4, %v401_v10  ;;  %v216_v12 = vpop.permute.xlu1 %215  ;;  %v214_v13 = vpop.permute.xlu0 %213  ;;  %v446_v14 = vld [vmem:[#allocation2 + $0x30] sm:$0x33]  ;;  %675 = vmatprep.subr.bf16.mxu1 %v739_v24 }
  0x9b   : > { %406 = vst [vmem:[#allocation2 + $0x24] sm:$0xcc] %v403_v11  ;;  %v218_v15 = vrot.slane %v216_v12, 4  ;;  %227 = vst.msk [vmem:[#allocation2 + $0x8] sm:$0xc] %vm226_vm2, %v216_v12  ;;  %v217_v16 = vrot.slane %v214_v13, 4  ;;  %v662_v17 = vcombine.high %v446_v14, %v446_v14  ;;  %v661_v18 = vcombine.low %v446_v14, %v446_v14 }
  0x9d   : > { %v220_v19 = vsel %vm219_vm3, %v217_v16, %v218_v15  ;;  %664 = vmatprep.subr.msk.bf16.mxu0 %vm497_vm8, %v662_v17  ;;  %v499_v20 = vsel %vm497_vm8, %v661_v18, 0 }
  0x9e   : > { %v222_v21 = vsel %vm221_vm10, %v214_v13, %v220_v19  ;;  %518 = vmatpush1.bf16.msra.mxu0 %v499_v20  ;;  %v248_v22 = vpop.permute.xlu1 %247  ;;  %v246_v23 = vpop.permute.xlu0 %245 }
  0x9f   : > { %v718_v25 = vld [vmem:[#allocation2 + $0x20] ss:$12 sps:$4 sm:$0xff]   ;;  %225 = vst [vmem:[#allocation2] sm:$0xcc] %v222_v21  ;;  %v250_v26 = vrot.slane %v248_v22, 4  ;;  %v249_v27 = vrot.slane %v246_v23, 4 }
  0xa0   : > { %257 = vst.msk [vmem:[#allocation2 + $0x14] sm:$0x3] %vm194_vm0, %v248_v22  ;;  %676 = vmatpush3.bf16.msra.mxu1 %v718_v25 }
  0xa1   : > { %v251_v28 = vsel %vm219_vm3, %v249_v27, %v250_v26  ;;  %677 = vmatprep.subr.bf16.mxu1 %v739_v24  ;;  %v172_v24 = vld [vmem:[%s848_s1] sm:$0xf] }
  0xa2   : > { %v253_v29 = vsel %vm252_vm11, %v246_v23, %v251_v28  ;;  %v278_v30 = vpop.permute.xlu1 %277  ;;  %v276_v31 = vpop.permute.xlu0 %275  ;;  %v719_v32 = vld [vmem:[#allocation2 + $0x1c] ss:$12 sps:$4 sm:$0xff]   ;;  %v721_v33 = vld [vmem:[#allocation2 + $0x18] ss:$12 sps:$4 sm:$0xff]  }
  0xa3   : > { %256 = vst [vmem:[#allocation2 + $0xc] sm:$0x33] %v253_v29  ;;  %v280_v34 = vrot.slane %v278_v30, 4  ;;  %287 = vst.msk [vmem:[#allocation2 + $0x14] sm:$0xc] %vm226_vm2, %v278_v30  ;;  %v279_v35 = vrot.slane %v276_v31, 4  ;;  %519 = vmatprep.subr.bf16.mxu0 %v719_v32 }
  0xa4   : > { %520 = vmatpush1.bf16.msra.mxu0 %v721_v33 }
  0xa5   : > { %v281_v36 = vsel %vm219_vm3, %v279_v35, %v280_v34 }
  0xa6   : > { %v283_v37 = vsel %vm282_vm12, %v276_v31, %v281_v36 }
  0xa7   : > { %286 = vst [vmem:[#allocation2 + $0xc] sm:$0xcc] %v283_v37 }
  0xaa   : > { %v722_v38 = vld [vmem:[#allocation2 + $0x8] ss:$12 sps:$4 sm:$0xff]  }
  0xab   : > { %678 = vmatpush3.bf16.msra.mxu1 %v722_v38 }
  0xae   : > { %v723_v39 = vld [vmem:[#allocation2 + $0x4] ss:$12 sps:$4 sm:$0xff]   ;;  %v725_v40 = vld [vmem:[#allocation2] ss:$12 sps:$4 sm:$0xff]   ;;  %680 = vmatmul.mubr.msk.bf16.vlgmr.msra.gmra.mxu1 %vm493_vm13, %v172_v24 }
  0xaf   : > { %521 = vmatprep.subr.bf16.mxu0 %v723_v39  ;;  %v451_v41 = vpop.permute.xlu0 %450 }
  0xb0   : > { %522 = vmatpush1.bf16.msra.mxu0 %v725_v40 }
  0xb3   : > { %665 = vmatmul.mubr.msk.bf16.vlgmr.msra.gmra.mxu0 %vm493_vm13, %v172_v24 }
 0x16e   : > { %v582_v42 = vpop.f32.mrf.mxu1 }
 0x16f   : > { %v583_v43 = vadd.f32 %v582_v42, %v451_v41 }
 0x170   : > { %v681_v44 = vpop.f32.mrf.mxu1 }
 0x171   : > { %591 = vst.msk [vmem:[%s170_s6 + $0x10] sm:$0xff] %vm590_vm14, %v583_v43 }
 0x172   : > { %v585_v45 = vpop.f32.mrf.mxu1 }
 0x173   : > { %v541_v46 = vpop.f32.mrf.mxu0 }
 0x174   : > { %v542_v47 = vadd.f32 %v541_v46, %v451_v41  ;;  %v682_v48 = vpop.f32.mrf.mxu1 }
 0x175   : > { %v543_v49 = vpop.f32.mrf.mxu0 }
 0x176   : > { %588 = vst [vmem:[%s170_s6] sm:$0xff] %v542_v47  ;;  %v544_v50 = vadd.f32 %v543_v49, %v451_v41 }
 0x177   : > { %v545_v51 = vpop.f32.mrf.mxu0 }
 0x178   : > { %589 = vst [vmem:[%s170_s6 + $0x8] sm:$0xff] %v544_v50 }
 0x179   : > { %v546_v52 = vpop.f32.mrf.mxu0 }
 0x17a PF: > { %s13_s12 = sadd.s32 1, %s732_s12  }
 0x17b   : > { %p10_p4 = scmp.ge.s32.totalorder %s13_s12, 4  }
 0x17d   :  { %12 = sbr.rel (!%p10_p4) target bundleno = 1 (0x1), region = 62 }

</bundles_post_ra>
